<compile_context>
chip_gen: v7x
topology: tpu7x:2x2x1
jax: 0.10.0
libtpu: 0.0.40
codegen_flags: <defaults>
</compile_context>

<pallas_src>
import jax
import jax.numpy as jnp
from jax import lax
from jax.experimental import pallas as pl
from jax.experimental.pallas import tpu as pltpu

HIDDEN = 256            # hidden_size in the PyTorch module
N1 = HIDDEN // 2 + 1    # 129 = real width of the first hidden layer
N1_PAD = 256            # first hidden layer zero-padded to lane-aligned width
LN_EPS = 1e-5


# ----------------------------- Pallas kernel --------------------------------
def _layernorm(h, gamma, beta):
    mu = jnp.mean(h, axis=-1, keepdims=True)
    d = h - mu
    var = jnp.mean(d * d, axis=-1, keepdims=True)
    return d * lax.rsqrt(var + LN_EPS) * gamma + beta


def _critic_kernel(x_ref,
                   w1_ref, b1_ref, g1_ref, be1_ref,
                   w2_ref, b2_ref, g2_ref, be2_ref,
                   w3_ref, b3_ref, g3_ref, be3_ref,
                   w4_ref, b4_ref,
                   out_ref):
    # Hoist the small (1, N) parameters once per tile.
    b1, g1, be1 = b1_ref[...], g1_ref[...], be1_ref[...]
    b2, g2, be2 = b2_ref[...], g2_ref[...], be2_ref[...]
    b3, g3, be3 = b3_ref[...], g3_ref[...], be3_ref[...]
    w4, b4 = w4_ref[...], b4_ref[...]

    x = x_ref[...]
    if x.dtype != jnp.bfloat16:           # static (trace-time) dtype branch
        x = x.astype(jnp.bfloat16)

    # ---- l1a: Linear(input_dim, 129), output zero-padded to 256 lanes ----
    h = jnp.dot(x, w1_ref[...], preferred_element_type=jnp.float32) + b1

    # LayerNorm over the 129 *real* features (two-pass, masked). Pad lanes of
    # h are exactly 0 (zero weight columns / zero bias), so the full-lane sum
    # equals the sum over the real features; divide by 129 and mask the
    # centered values so pad lanes do not pollute the variance. gamma/beta are
    # zero-padded, forcing pad lanes back to exactly 0 afterwards.
    lane = lax.broadcasted_iota(jnp.int32, (1, N1_PAD), 1)
    lane_mask = (lane < N1).astype(jnp.float32)
    inv_n1 = 1.0 / float(N1)
    mu1 = jnp.sum(h, axis=-1, keepdims=True) * inv_n1
    d1 = (h - mu1) * lane_mask
    var1 = jnp.sum(d1 * d1, axis=-1, keepdims=True) * inv_n1
    h = d1 * lax.rsqrt(var1 + LN_EPS) * g1 + be1
    h = jnp.maximum(h, 0.0)

    # ---- l1b: Linear(129 -> 256) (K zero-padded to 256) -> LN -> ReLU ----
    h = jnp.dot(h.astype(jnp.bfloat16), w2_ref[...],
                preferred_element_type=jnp.float32) + b2
    h = jnp.maximum(_layernorm(h, g2, be2), 0.0)

    # ---- l2: ONE Linear(256, 512) with columns packed [even | odd];
    #      MaxPool1d(2,2) == max of the two lane-aligned 256-wide halves ----
    y = jnp.dot(h.astype(jnp.bfloat16), w3_ref[...],
                preferred_element_type=jnp.float32) + b3
    h = jnp.maximum(y[:, :HIDDEN], y[:, HIDDEN:])
    h = jnp.maximum(_layernorm(h, g3, be3), 0.0)

    # ---- value head: Linear(256, 1) as VPU multiply + XLU lane reduction ----
    # Kept off the MXU on purpose: the MXU is the binding unit, VPU/XLU/EUP
    # have slack under this regime.
    v = jnp.sum(h * w4, axis=-1, keepdims=True) + b4          # (TB, 1)
    out_ref[...] = v                                           # 4 B/row store


# ------------------------------- wrapper -------------------------------------
def _round_up(x, m):
    return ((x + m - 1) // m) * m


def net_critic_forward(state, params, *, tile_b=1024):
    """state: (B, input_dim) f32 or bf16; returns (B, 1) f32."""
    B, input_dim = state.shape

    # Batch tile: big enough to amortize per-grid-step overhead, but chosen so
    # the grid has >= 2 steps when B allows it (v7x megacore sharding via
    # dimension_semantics=("parallel",)). Granularity 16 keeps bf16 inputs
    # sublane-aligned; f32 only needs 8, so 16 is safe for both.
    tb = max(16, min(tile_b, _round_up(pl.cdiv(B, 2), 16)))
    b_pad = _round_up(B, tb)
    if b_pad != B:
        state = jnp.pad(state, ((0, b_pad - B), (0, 0)))

    weight_args = (
        params["w1"], params["b1"], params["g1"], params["be1"],
        params["w2"], params["b2"], params["g2"], params["be2"],
        params["w3"], params["b3"], params["g3"], params["be3"],
        params["w4"], params["b4"],
    )

    def resident_spec(shape):
        nd = len(shape)
        # Block index never changes across the grid -> single buffer: no point
        # double-buffering never-changing weights (VMEM headroom, esp. w1).
        return pl.BlockSpec(shape, lambda i, _nd=nd: (0,) * _nd,
                            pipeline_mode=pl.Buffered(1))

    in_specs = ([pl.BlockSpec((tb, input_dim), lambda i: (i, 0))] +
                [resident_spec(a.shape) for a in weight_args])
    # Output block last dim (1) equals the full array dim, so the block is
    # legal; writeback is a contiguous tb*4 B DMA instead of tb*512 B for the
    # old 128-lane f32 broadcast.
    out_spec = pl.BlockSpec((tb, 1), lambda i: (i, 0))

    flops = 2 * b_pad * (input_dim * N1_PAD + N1_PAD * HIDDEN
                         + HIDDEN * 2 * HIDDEN + HIDDEN)
    bytes_accessed = (int(state.size) * state.dtype.itemsize
                      + sum(int(a.size) * a.dtype.itemsize for a in weight_args)
                      + b_pad * 4)
    cost = pl.CostEstimate(flops=flops, transcendentals=3 * b_pad,
                           bytes_accessed=bytes_accessed)

    out = pl.pallas_call(
        _critic_kernel,
        out_shape=jax.ShapeDtypeStruct((b_pad, 1), jnp.float32),
        grid=(b_pad // tb,),
        in_specs=in_specs,
        out_specs=out_spec,
        compiler_params=pltpu.CompilerParams(
            dimension_semantics=("parallel",),
            # Explicit scoped-VMEM headroom so big batch tiles don't hit the
            # 16 MiB (v5e) / 32 MiB (v6e, v7x) defaults; 56 MiB < v7x physical.
            vmem_limit_bytes=56 * 1024 * 1024,
        ),
        cost_estimate=cost,
    )(state, *weight_args)
    return out[:B]


# --------------------------- parameter handling ------------------------------
def _orthogonal(key, out_dim, in_dim, gain):
    """Mimics torch.nn.init.orthogonal_ for a (out_dim, in_dim) weight."""
    a = jax.random.normal(key, (out_dim, in_dim), dtype=jnp.float32)
    transposed = out_dim < in_dim
    if transposed:
        a = a.T
    q, r = jnp.linalg.qr(a)
    q = q * jnp.sign(jnp.diagonal(r))[None, :]
    if transposed:
        q = q.T
    return gain * q


def pack_l2_linear(w3, b3):
    """Pack Linear(256, 512) weight columns AND bias as [even | odd] so that
    MaxPool1d(2, 2) becomes a max of two lane-aligned 256-wide halves.

    NOTE: when loading trained PyTorch checkpoints the bias MUST go through
    this same permutation — forgetting it silently corrupts the MaxPool trick.
    """
    w3_packed = jnp.concatenate([w3[:, 0::2], w3[:, 1::2]], axis=1)  # (256,512)
    b3_packed = jnp.concatenate([b3[0::2], b3[1::2]])                # (512,)
    return w3_packed, b3_packed


def init_net_critic_params(key, obs_size, n_agents, frame_stack=4):
    input_dim = n_agents * obs_size * frame_stack
    h = HIDDEN
    gain_relu = 2.0 ** 0.5   # init.calculate_gain('relu')

    k1, k2, k3, k4 = jax.random.split(key, 4)

    # PyTorch convention is (out, in); transpose to (in, out) for x @ W.
    w1 = _orthogonal(k1, N1, input_dim, gain_relu).T        # (input_dim, 129)
    w2 = _orthogonal(k2, h, N1, gain_relu).T                # (129, 256)
    w3 = _orthogonal(k3, 2 * h, h, gain_relu).T             # (256, 512)
    w4 = _orthogonal(k4, 1, h, 1.0).T                       # (256, 1)
    b3_raw = jnp.zeros((2 * h,), jnp.float32)               # Linear bias = 0

    # Pad first hidden width 129 -> 256 with zero columns / rows.
    w1_pad = jnp.zeros((input_dim, N1_PAD), jnp.float32).at[:, :N1].set(w1)
    w2_pad = jnp.zeros((N1_PAD, h), jnp.float32).at[:N1, :].set(w2)
    w3_pack, b3_pack = pack_l2_linear(w3, b3_raw)

    params = {
        # MXU weights stored bf16 (f32 accumulation in-kernel).
        "w1": w1_pad.astype(jnp.bfloat16),
        "b1": jnp.zeros((1, N1_PAD), jnp.float32),
        "g1": jnp.zeros((1, N1_PAD), jnp.float32).at[:, :N1].set(1.0),
        "be1": jnp.zeros((1, N1_PAD), jnp.float32),
        "w2": w2_pad.astype(jnp.bfloat16),
        "b2": jnp.zeros((1, h), jnp.float32),
        "g2": jnp.ones((1, h), jnp.float32),
        "be2": jnp.zeros((1, h), jnp.float32),
        "w3": w3_pack.astype(jnp.bfloat16),
        "b3": b3_pack.reshape(1, 2 * h),
        "g3": jnp.ones((1, h), jnp.float32),
        "be3": jnp.zeros((1, h), jnp.float32),
        # value head stays f32 (VPU multiply + XLU reduction, no MXU).
        "w4": w4.T,                                   # (1, 256)
        "b4": jnp.zeros((1, 1), jnp.float32),
    }
    # Unpacked / unpadded f32 weights for the pure-JAX reference check.
    ref = {"w1": w1, "w2": w2, "w3": w3, "w4": w4}
    return params, ref, input_dim


# ----------------------------- pure-JAX reference ----------------------------
def net_critic_reference(state, ref):
    """Reference forward (original PyTorch structure) with the same bf16
    MXU-boundary casts as the kernel, so the check isolates kernel structure
    from the (accepted) bf16 numerics tradeoff."""
    def ln(t):  # LayerNorm with gamma=1, beta=0 (init-time values)
        mu = jnp.mean(t, axis=-1, keepdims=True)
        var = jnp.mean((t - mu) ** 2, axis=-1, keepdims=True)
        return (t - mu) * lax.rsqrt(var + LN_EPS)

    bf = jnp.bfloat16
    h = jnp.dot(state.astype(bf), ref["w1"].astype(bf),
                preferred_element_type=jnp.float32)           # (B, 129)
    h = jnp.maximum(ln(h), 0.0)
    h = jnp.dot(h.astype(bf), ref["w2"].astype(bf),
                preferred_element_type=jnp.float32)           # (B, 256)
    h = jnp.maximum(ln(h), 0.0)
    y = jnp.dot(h.astype(bf), ref["w3"].astype(bf),
                preferred_element_type=jnp.float32)           # (B, 512)
    y = jnp.max(y.reshape(y.shape[0], HIDDEN, 2), axis=-1)    # MaxPool1d(2, 2)
    h = jnp.maximum(ln(y), 0.0)
    return h @ ref["w4"]                                      # (B, 1)


# ------------------------------- main ----------------------------------------
if __name__ == "__main__":
    key = jax.random.PRNGKey(0)
    kp, kx = jax.random.split(key)

    # Small, module-consistent config: obs_size=4, n_agents=2, frame_stack=4
    # -> input_dim = 32; batch = 8.
    obs_size, n_agents, frame_stack, batch = 4, 2, 4, 8
    params, ref, input_dim = init_net_critic_params(kp, obs_size, n_agents,
                                                    frame_stack)

    state = jax.random.normal(kx, (batch, input_dim), dtype=jnp.float32)

    value = jax.block_until_ready(net_critic_forward(state, params))
    expected = jax.block_until_ready(net_critic_reference(state, ref))

    assert value.shape == (batch, 1)
    assert bool(jnp.all(jnp.isfinite(value)))
    assert bool(jnp.allclose(value, expected, rtol=1e-2, atol=1e-2))
    print("KERNEL_OK")
</pallas_src>

<mosaic_0001>
module attributes {stable_mosaic.version = 11 : i64} {
  func.func @_critic_kernel(%arg0: i32, %arg1: memref<16x32xf32, #tpu.memory_space<vmem>>, %arg2: memref<32x256xbf16, #tpu.memory_space<vmem>>, %arg3: memref<1x256xf32, #tpu.memory_space<vmem>>, %arg4: memref<1x256xf32, #tpu.memory_space<vmem>>, %arg5: memref<1x256xf32, #tpu.memory_space<vmem>>, %arg6: memref<256x256xbf16, #tpu.memory_space<vmem>>, %arg7: memref<1x256xf32, #tpu.memory_space<vmem>>, %arg8: memref<1x256xf32, #tpu.memory_space<vmem>>, %arg9: memref<1x256xf32, #tpu.memory_space<vmem>>, %arg10: memref<256x512xbf16, #tpu.memory_space<vmem>>, %arg11: memref<1x512xf32, #tpu.memory_space<vmem>>, %arg12: memref<1x256xf32, #tpu.memory_space<vmem>>, %arg13: memref<1x256xf32, #tpu.memory_space<vmem>>, %arg14: memref<1x256xf32, #tpu.memory_space<vmem>>, %arg15: memref<1x1xf32, #tpu.memory_space<vmem>>, %arg16: memref<16x1xf32, #tpu.memory_space<vmem>>) attributes {dimension_semantics = [#tpu.dimension_semantics<parallel>], iteration_bounds = array<i64: 1>, scalar_prefetch = 0 : i64, scratch_operands = 0 : i64, tpu.core_type = #tpu.core_type<tc>, window_params = [{transform_indices = @transform_0, window_bounds = array<i64: 16, 32>}, {pipeline_mode = #tpu.pipeline_mode<synchronous>, transform_indices = @transform_1, window_bounds = array<i64: 32, 256>}, {pipeline_mode = #tpu.pipeline_mode<synchronous>, transform_indices = @transform_2, window_bounds = array<i64: 1, 256>}, {pipeline_mode = #tpu.pipeline_mode<synchronous>, transform_indices = @transform_3, window_bounds = array<i64: 1, 256>}, {pipeline_mode = #tpu.pipeline_mode<synchronous>, transform_indices = @transform_4, window_bounds = array<i64: 1, 256>}, {pipeline_mode = #tpu.pipeline_mode<synchronous>, transform_indices = @transform_5, window_bounds = array<i64: 256, 256>}, {pipeline_mode = #tpu.pipeline_mode<synchronous>, transform_indices = @transform_6, window_bounds = array<i64: 1, 256>}, {pipeline_mode = #tpu.pipeline_mode<synchronous>, transform_indices = @transform_7, window_bounds = array<i64: 1, 256>}, {pipeline_mode = #tpu.pipeline_mode<synchronous>, transform_indices = @transform_8, window_bounds = array<i64: 1, 256>}, {pipeline_mode = #tpu.pipeline_mode<synchronous>, transform_indices = @transform_9, window_bounds = array<i64: 256, 512>}, {pipeline_mode = #tpu.pipeline_mode<synchronous>, transform_indices = @transform_10, window_bounds = array<i64: 1, 512>}, {pipeline_mode = #tpu.pipeline_mode<synchronous>, transform_indices = @transform_11, window_bounds = array<i64: 1, 256>}, {pipeline_mode = #tpu.pipeline_mode<synchronous>, transform_indices = @transform_12, window_bounds = array<i64: 1, 256>}, {pipeline_mode = #tpu.pipeline_mode<synchronous>, transform_indices = @transform_13, window_bounds = array<i64: 1, 256>}, {pipeline_mode = #tpu.pipeline_mode<synchronous>, transform_indices = @transform_14, window_bounds = array<i64: 1, 1>}, {transform_indices = @transform_15, window_bounds = array<i64: 16, 1>}]} {
    %c0 = arith.constant 0 : index
    %c0_0 = arith.constant 0 : index
    %0 = vector.load %arg3[%c0, %c0_0] : memref<1x256xf32, #tpu.memory_space<vmem>>, vector<1x256xf32>
    %c0_1 = arith.constant 0 : index
    %c0_2 = arith.constant 0 : index
    %1 = vector.load %arg4[%c0_1, %c0_2] : memref<1x256xf32, #tpu.memory_space<vmem>>, vector<1x256xf32>
    %c0_3 = arith.constant 0 : index
    %c0_4 = arith.constant 0 : index
    %2 = vector.load %arg5[%c0_3, %c0_4] : memref<1x256xf32, #tpu.memory_space<vmem>>, vector<1x256xf32>
    %c0_5 = arith.constant 0 : index
    %c0_6 = arith.constant 0 : index
    %3 = vector.load %arg7[%c0_5, %c0_6] : memref<1x256xf32, #tpu.memory_space<vmem>>, vector<1x256xf32>
    %c0_7 = arith.constant 0 : index
    %c0_8 = arith.constant 0 : index
    %4 = vector.load %arg8[%c0_7, %c0_8] : memref<1x256xf32, #tpu.memory_space<vmem>>, vector<1x256xf32>
    %c0_9 = arith.constant 0 : index
    %c0_10 = arith.constant 0 : index
    %5 = vector.load %arg9[%c0_9, %c0_10] : memref<1x256xf32, #tpu.memory_space<vmem>>, vector<1x256xf32>
    %c0_11 = arith.constant 0 : index
    %c0_12 = arith.constant 0 : index
    %6 = vector.load %arg11[%c0_11, %c0_12] : memref<1x512xf32, #tpu.memory_space<vmem>>, vector<1x512xf32>
    %c0_13 = arith.constant 0 : index
    %c0_14 = arith.constant 0 : index
    %7 = vector.load %arg12[%c0_13, %c0_14] : memref<1x256xf32, #tpu.memory_space<vmem>>, vector<1x256xf32>
    %c0_15 = arith.constant 0 : index
    %c0_16 = arith.constant 0 : index
    %8 = vector.load %arg13[%c0_15, %c0_16] : memref<1x256xf32, #tpu.memory_space<vmem>>, vector<1x256xf32>
    %c0_17 = arith.constant 0 : index
    %c0_18 = arith.constant 0 : index
    %9 = vector.load %arg14[%c0_17, %c0_18] : memref<1x256xf32, #tpu.memory_space<vmem>>, vector<1x256xf32>
    %c0_19 = arith.constant 0 : index
    %c0_20 = arith.constant 0 : index
    %10 = vector.load %arg15[%c0_19, %c0_20] : memref<1x1xf32, #tpu.memory_space<vmem>>, vector<1x1xf32>
    %c0_21 = arith.constant 0 : index
    %c0_22 = arith.constant 0 : index
    %11 = vector.load %arg1[%c0_21, %c0_22] : memref<16x32xf32, #tpu.memory_space<vmem>>, vector<16x32xf32>
    %12 = arith.truncf %11 : vector<16x32xf32> to vector<16x32xbf16>
    %c0_23 = arith.constant 0 : index
    %c0_24 = arith.constant 0 : index
    %13 = vector.load %arg2[%c0_23, %c0_24] : memref<32x256xbf16, #tpu.memory_space<vmem>>, vector<32x256xbf16>
    %cst = arith.constant dense<0.000000e+00> : vector<16x256xf32>
    %14 = tpu.matmul %12, %13, %cst {dimension_numbers = #tpu.dot_dimension_numbers<[1], [0], [0], [1], [0, 0, 1, 1], [], []>} : vector<16x32xbf16>, vector<32x256xbf16>, vector<16x256xf32> -> vector<16x256xf32>
    %15 = vector.broadcast %0 : vector<1x256xf32> to vector<16x256xf32>
    %16 = arith.addf %14, %15 : vector<16x256xf32>
    %17 = tpu.iota {dimensions = array<i32: 1>} : vector<1x256xi32>
    %c129_i32 = arith.constant 129 : i32
    %18 = vector.broadcast %c129_i32 : i32 to vector<1x256xi32>
    %19 = arith.cmpi slt, %17, %18 : vector<1x256xi32>
    %20 = arith.extui %19 : vector<1x256xi1> to vector<1x256xi32>
    %21 = arith.sitofp %20 : vector<1x256xi32> to vector<1x256xf32>
    %cst_25 = arith.constant dense<0.000000e+00> : vector<16xf32>
    %22 = vector.multi_reduction <add>, %16, %cst_25 [1] : vector<16x256xf32> to vector<16xf32>
    %23 = vector.shape_cast %22 : vector<16xf32> to vector<16x1xf32>
    %cst_26 = arith.constant 0.00775193795 : f32
    %24 = vector.broadcast %cst_26 : f32 to vector<16x1xf32>
    %25 = arith.mulf %23, %24 : vector<16x1xf32>
    %26 = vector.broadcast %25 : vector<16x1xf32> to vector<16x256xf32>
    %27 = arith.subf %16, %26 : vector<16x256xf32>
    %28 = vector.broadcast %21 : vector<1x256xf32> to vector<16x256xf32>
    %29 = arith.mulf %27, %28 : vector<16x256xf32>
    %30 = arith.mulf %29, %29 : vector<16x256xf32>
    %cst_27 = arith.constant dense<0.000000e+00> : vector<16xf32>
    %31 = vector.multi_reduction <add>, %30, %cst_27 [1] : vector<16x256xf32> to vector<16xf32>
    %32 = vector.shape_cast %31 : vector<16xf32> to vector<16x1xf32>
    %cst_28 = arith.constant 0.00775193795 : f32
    %33 = vector.broadcast %cst_28 : f32 to vector<16x1xf32>
    %34 = arith.mulf %32, %33 : vector<16x1xf32>
    %cst_29 = arith.constant 9.99999974E-6 : f32
    %35 = vector.broadcast %cst_29 : f32 to vector<16x1xf32>
    %36 = arith.addf %34, %35 : vector<16x1xf32>
    %37 = math.rsqrt %36 : vector<16x1xf32>
    %38 = vector.broadcast %37 : vector<16x1xf32> to vector<16x256xf32>
    %39 = arith.mulf %29, %38 : vector<16x256xf32>
    %40 = vector.broadcast %1 : vector<1x256xf32> to vector<16x256xf32>
    %41 = arith.mulf %39, %40 : vector<16x256xf32>
    %42 = vector.broadcast %2 : vector<1x256xf32> to vector<16x256xf32>
    %43 = arith.addf %41, %42 : vector<16x256xf32>
    %cst_30 = arith.constant 0.000000e+00 : f32
    %44 = vector.broadcast %cst_30 : f32 to vector<16x256xf32>
    %45 = arith.maximumf %43, %44 : vector<16x256xf32>
    %46 = arith.truncf %45 : vector<16x256xf32> to vector<16x256xbf16>
    %c0_31 = arith.constant 0 : index
    %c0_32 = arith.constant 0 : index
    %47 = vector.load %arg6[%c0_31, %c0_32] : memref<256x256xbf16, #tpu.memory_space<vmem>>, vector<256x256xbf16>
    %cst_33 = arith.constant dense<0.000000e+00> : vector<16x256xf32>
    %48 = tpu.matmul %46, %47, %cst_33 {dimension_numbers = #tpu.dot_dimension_numbers<[1], [0], [0], [1], [0, 0, 1, 1], [], []>} : vector<16x256xbf16>, vector<256x256xbf16>, vector<16x256xf32> -> vector<16x256xf32>
    %49 = vector.broadcast %3 : vector<1x256xf32> to vector<16x256xf32>
    %50 = arith.addf %48, %49 : vector<16x256xf32>
    %cst_34 = arith.constant dense<0.000000e+00> : vector<16xf32>
    %51 = vector.multi_reduction <add>, %50, %cst_34 [1] : vector<16x256xf32> to vector<16xf32>
    %52 = vector.shape_cast %51 : vector<16xf32> to vector<16x1xf32>
    %cst_35 = arith.constant 2.560000e+02 : f32
    %53 = vector.broadcast %cst_35 : f32 to vector<16x1xf32>
    %54 = arith.divf %52, %53 : vector<16x1xf32>
    %55 = vector.broadcast %54 : vector<16x1xf32> to vector<16x256xf32>
    %56 = arith.subf %50, %55 : vector<16x256xf32>
    %57 = arith.mulf %56, %56 : vector<16x256xf32>
    %cst_36 = arith.constant dense<0.000000e+00> : vector<16xf32>
    %58 = vector.multi_reduction <add>, %57, %cst_36 [1] : vector<16x256xf32> to vector<16xf32>
    %59 = vector.shape_cast %58 : vector<16xf32> to vector<16x1xf32>
    %cst_37 = arith.constant 2.560000e+02 : f32
    %60 = vector.broadcast %cst_37 : f32 to vector<16x1xf32>
    %61 = arith.divf %59, %60 : vector<16x1xf32>
    %cst_38 = arith.constant 9.99999974E-6 : f32
    %62 = vector.broadcast %cst_38 : f32 to vector<16x1xf32>
    %63 = arith.addf %61, %62 : vector<16x1xf32>
    %64 = math.rsqrt %63 : vector<16x1xf32>
    %65 = vector.broadcast %64 : vector<16x1xf32> to vector<16x256xf32>
    %66 = arith.mulf %56, %65 : vector<16x256xf32>
    %67 = vector.broadcast %4 : vector<1x256xf32> to vector<16x256xf32>
    %68 = arith.mulf %66, %67 : vector<16x256xf32>
    %69 = vector.broadcast %5 : vector<1x256xf32> to vector<16x256xf32>
    %70 = arith.addf %68, %69 : vector<16x256xf32>
    %cst_39 = arith.constant 0.000000e+00 : f32
    %71 = vector.broadcast %cst_39 : f32 to vector<16x256xf32>
    %72 = arith.maximumf %70, %71 : vector<16x256xf32>
    %73 = arith.truncf %72 : vector<16x256xf32> to vector<16x256xbf16>
    %c0_40 = arith.constant 0 : index
    %c0_41 = arith.constant 0 : index
    %74 = vector.load %arg10[%c0_40, %c0_41] : memref<256x512xbf16, #tpu.memory_space<vmem>>, vector<256x512xbf16>
    %cst_42 = arith.constant dense<0.000000e+00> : vector<16x512xf32>
    %75 = tpu.matmul %73, %74, %cst_42 {dimension_numbers = #tpu.dot_dimension_numbers<[1], [0], [0], [1], [0, 0, 1, 1], [], []>} : vector<16x256xbf16>, vector<256x512xbf16>, vector<16x512xf32> -> vector<16x512xf32>
    %76 = vector.broadcast %6 : vector<1x512xf32> to vector<16x512xf32>
    %77 = arith.addf %75, %76 : vector<16x512xf32>
    %78 = vector.extract_strided_slice %77 {offsets = [0, 0], sizes = [16, 256], strides = [1, 1]} : vector<16x512xf32> to vector<16x256xf32>
    %79 = vector.extract_strided_slice %77 {offsets = [0, 256], sizes = [16, 256], strides = [1, 1]} : vector<16x512xf32> to vector<16x256xf32>
    %80 = arith.maximumf %78, %79 : vector<16x256xf32>
    %cst_43 = arith.constant dense<0.000000e+00> : vector<16xf32>
    %81 = vector.multi_reduction <add>, %80, %cst_43 [1] : vector<16x256xf32> to vector<16xf32>
    %82 = vector.shape_cast %81 : vector<16xf32> to vector<16x1xf32>
    %cst_44 = arith.constant 2.560000e+02 : f32
    %83 = vector.broadcast %cst_44 : f32 to vector<16x1xf32>
    %84 = arith.divf %82, %83 : vector<16x1xf32>
    %85 = vector.broadcast %84 : vector<16x1xf32> to vector<16x256xf32>
    %86 = arith.subf %80, %85 : vector<16x256xf32>
    %87 = arith.mulf %86, %86 : vector<16x256xf32>
    %cst_45 = arith.constant dense<0.000000e+00> : vector<16xf32>
    %88 = vector.multi_reduction <add>, %87, %cst_45 [1] : vector<16x256xf32> to vector<16xf32>
    %89 = vector.shape_cast %88 : vector<16xf32> to vector<16x1xf32>
    %cst_46 = arith.constant 2.560000e+02 : f32
    %90 = vector.broadcast %cst_46 : f32 to vector<16x1xf32>
    %91 = arith.divf %89, %90 : vector<16x1xf32>
    %cst_47 = arith.constant 9.99999974E-6 : f32
    %92 = vector.broadcast %cst_47 : f32 to vector<16x1xf32>
    %93 = arith.addf %91, %92 : vector<16x1xf32>
    %94 = math.rsqrt %93 : vector<16x1xf32>
    %95 = vector.broadcast %94 : vector<16x1xf32> to vector<16x256xf32>
    %96 = arith.mulf %86, %95 : vector<16x256xf32>
    %97 = vector.broadcast %7 : vector<1x256xf32> to vector<16x256xf32>
    %98 = arith.mulf %96, %97 : vector<16x256xf32>
    %99 = vector.broadcast %8 : vector<1x256xf32> to vector<16x256xf32>
    %100 = arith.addf %98, %99 : vector<16x256xf32>
    %cst_48 = arith.constant 0.000000e+00 : f32
    %101 = vector.broadcast %cst_48 : f32 to vector<16x256xf32>
    %102 = arith.maximumf %100, %101 : vector<16x256xf32>
    %103 = vector.broadcast %9 : vector<1x256xf32> to vector<16x256xf32>
    %104 = arith.mulf %102, %103 : vector<16x256xf32>
    %cst_49 = arith.constant dense<0.000000e+00> : vector<16xf32>
    %105 = vector.multi_reduction <add>, %104, %cst_49 [1] : vector<16x256xf32> to vector<16xf32>
    %106 = vector.shape_cast %105 : vector<16xf32> to vector<16x1xf32>
    %107 = vector.broadcast %10 : vector<1x1xf32> to vector<16x1xf32>
    %108 = arith.addf %106, %107 : vector<16x1xf32>
    %c0_50 = arith.constant 0 : index
    %c0_51 = arith.constant 0 : index
    %109 = vector.load %arg16[%c0_50, %c0_51] : memref<16x1xf32, #tpu.memory_space<vmem>>, vector<16x1xf32>
    tpu.vector_store %arg16[%c0_50, %c0_51], %108 {strides = array<i32>} : memref<16x1xf32, #tpu.memory_space<vmem>>, vector<16x1xf32>,
    return
  }
  func.func @transform_0(%arg0: i32) -> (i32, i32) {
    %c0_i32 = arith.constant 0 : i32
    %c0_i32_0 = arith.constant 0 : i32
    return %arg0, %c0_i32 : i32, i32
  }
  func.func @transform_1(%arg0: i32) -> (i32, i32) {
    %c0_i32 = arith.constant 0 : i32
    %c0_i32_0 = arith.constant 0 : i32
    %c0_i32_1 = arith.constant 0 : i32
    return %c0_i32, %c0_i32_0 : i32, i32
  }
  func.func @transform_2(%arg0: i32) -> (i32, i32) {
    %c0_i32 = arith.constant 0 : i32
    %c0_i32_0 = arith.constant 0 : i32
    %c0_i32_1 = arith.constant 0 : i32
    return %c0_i32, %c0_i32_0 : i32, i32
  }
  func.func @transform_3(%arg0: i32) -> (i32, i32) {
    %c0_i32 = arith.constant 0 : i32
    %c0_i32_0 = arith.constant 0 : i32
    %c0_i32_1 = arith.constant 0 : i32
    return %c0_i32, %c0_i32_0 : i32, i32
  }
  func.func @transform_4(%arg0: i32) -> (i32, i32) {
    %c0_i32 = arith.constant 0 : i32
    %c0_i32_0 = arith.constant 0 : i32
    %c0_i32_1 = arith.constant 0 : i32
    return %c0_i32, %c0_i32_0 : i32, i32
  }
  func.func @transform_5(%arg0: i32) -> (i32, i32) {
    %c0_i32 = arith.constant 0 : i32
    %c0_i32_0 = arith.constant 0 : i32
    %c0_i32_1 = arith.constant 0 : i32
    return %c0_i32, %c0_i32_0 : i32, i32
  }
  func.func @transform_6(%arg0: i32) -> (i32, i32) {
    %c0_i32 = arith.constant 0 : i32
    %c0_i32_0 = arith.constant 0 : i32
    %c0_i32_1 = arith.constant 0 : i32
    return %c0_i32, %c0_i32_0 : i32, i32
  }
  func.func @transform_7(%arg0: i32) -> (i32, i32) {
    %c0_i32 = arith.constant 0 : i32
    %c0_i32_0 = arith.constant 0 : i32
    %c0_i32_1 = arith.constant 0 : i32
    return %c0_i32, %c0_i32_0 : i32, i32
  }
  func.func @transform_8(%arg0: i32) -> (i32, i32) {
    %c0_i32 = arith.constant 0 : i32
    %c0_i32_0 = arith.constant 0 : i32
    %c0_i32_1 = arith.constant 0 : i32
    return %c0_i32, %c0_i32_0 : i32, i32
  }
  func.func @transform_9(%arg0: i32) -> (i32, i32) {
    %c0_i32 = arith.constant 0 : i32
    %c0_i32_0 = arith.constant 0 : i32
    %c0_i32_1 = arith.constant 0 : i32
    return %c0_i32, %c0_i32_0 : i32, i32
  }
  func.func @transform_10(%arg0: i32) -> (i32, i32) {
    %c0_i32 = arith.constant 0 : i32
    %c0_i32_0 = arith.constant 0 : i32
    %c0_i32_1 = arith.constant 0 : i32
    return %c0_i32, %c0_i32_0 : i32, i32
  }
  func.func @transform_11(%arg0: i32) -> (i32, i32) {
    %c0_i32 = arith.constant 0 : i32
    %c0_i32_0 = arith.constant 0 : i32
    %c0_i32_1 = arith.constant 0 : i32
    return %c0_i32, %c0_i32_0 : i32, i32
  }
  func.func @transform_12(%arg0: i32) -> (i32, i32) {
    %c0_i32 = arith.constant 0 : i32
    %c0_i32_0 = arith.constant 0 : i32
    %c0_i32_1 = arith.constant 0 : i32
    return %c0_i32, %c0_i32_0 : i32, i32
  }
  func.func @transform_13(%arg0: i32) -> (i32, i32) {
    %c0_i32 = arith.constant 0 : i32
    %c0_i32_0 = arith.constant 0 : i32
    %c0_i32_1 = arith.constant 0 : i32
    return %c0_i32, %c0_i32_0 : i32, i32
  }
  func.func @transform_14(%arg0: i32) -> (i32, i32) {
    %c0_i32 = arith.constant 0 : i32
    %c0_i32_0 = arith.constant 0 : i32
    %c0_i32_1 = arith.constant 0 : i32
    return %c0_i32, %c0_i32_0 : i32, i32
  }
  func.func @transform_15(%arg0: i32) -> (i32, i32) {
    %c0_i32 = arith.constant 0 : i32
    %c0_i32_0 = arith.constant 0 : i32
    return %arg0, %c0_i32 : i32, i32
  }
}

</mosaic_0001>

<bundles_post_ra>
// kernel: tpu_custom_call.1
= control target key start
LH: loop header
LB: loop body
LE: loop exit
PB: predicated region body
PF: predicated region fallthrough
CT: control target
= control target key end

     0   :  { %s1835_s0 = inlined_call_operand.hbm [shape: f32[16,32], index: 0, kind: input, shape index: {}]   ;;  %s1836_s1 = inlined_call_operand.hbm [shape: bf16[32,256], index: 1, kind: input, shape index: {}]   ;;  %s1837_s2 = inlined_call_operand.vmem [shape: f32[1,256], index: 2, kind: input, shape index: {}]   ;;  %s1838_s3 = inlined_call_operand.vmem [shape: f32[1,256], index: 3, kind: input, shape index: {}]   ;;  %s1839_s4 = inlined_call_operand.vmem [shape: f32[1,256], index: 4, kind: input, shape index: {}]   ;;  %s1840_s5 = inlined_call_operand.hbm [shape: bf16[256,256], index: 5, kind: input, shape index: {}]   ;;  %s1841_s6 = inlined_call_operand.vmem [shape: f32[1,256], index: 6, kind: input, shape index: {}]   ;;  %s1842_s7 = inlined_call_operand.vmem [shape: f32[1,256], index: 7, kind: input, shape index: {}]   ;;  %s1843_s8 = inlined_call_operand.vmem [shape: f32[1,256], index: 8, kind: input, shape index: {}]   ;;  %s1844_s9 = inlined_call_operand.hbm [shape: bf16[256,512], index: 9, kind: input, shape index: {}]   ;;  %s1845_s10 = inlined_call_operand.vmem [shape: f32[1,512], index: 10, kind: input, shape index: {}]   ;;  %s1846_s11 = inlined_call_operand.vmem [shape: f32[1,256], index: 11, kind: input, shape index: {}]   ;;  %s1847_s12 = inlined_call_operand.vmem [shape: f32[1,256], index: 12, kind: input, shape index: {}]   ;;  %s1848_s13 = inlined_call_operand.vmem [shape: f32[1,256], index: 13, kind: input, shape index: {}]   ;;  %s1849_s14 = inlined_call_operand.<no memory space> [shape: f32[1,1], index: 14, kind: input, shape index: {}]   ;;  %s1850_s15 = inlined_call_operand.vmem [shape: f32[16,1], index: 15, kind: output, shape index: {}]  }
   0x1   :  { %v20_v0 = vstv %s1849_s14 }
   0x2   :  { %21 = vst [vmem:[#allocation2] sm:$0x1] %v20_v0 }
   0x3   :  { %22 = vsyncpa [#allocation4], 0 }
   0x4   :  { %23 = vsyncpa [#allocation6], 0 }
   0x5   :  { %24 = vsyncpa [#allocation9], 0  ;;  %s1569_s20 = smov [#allocation5]   ;;  %s1570_s22 = smov [#allocation3]  }
   0x6   :  { %s42_s21 = sshll.u32 %s1569_s20, 4  ;;  %s30_s23 = sshll.u32 %s1570_s22, 4  ;;  %s43_s21 = int_to_ptr.vmem [resolvable:$true] %s42_s21  ;;  %s1662_s23 = int_to_ptr.vmem [resolvable:$true] %s30_s23 }
   0x7   :  { %s1475_s26 = scalar_lea.hbm %s1836_s1, 512 }
   0x8   :  { %p1476_p0 = scmp.ne.s32.totalorder %s1836_s1, %s1475_s26  ;;  %p1479_p1 = scmp.lt.u32.totalorder %s1475_s26, %s1836_s1 }
   0xa   :  { %p1481_p2 = pnand %p1479_p1, %p1476_p0 }
   0xc   :  { %1484 = shalt.err (!%p1481_p2)
}
   0xd   :  { %s1485_s30 = scalar_lea.vmem %s43_s21, 512  ;;  %p1490_p4 = scmp.lt.s32.totalorder %s43_s21, %s43_s21 }
   0xe   :  { %p1486_p3 = scmp.ne.s32.totalorder %s43_s21, %s1485_s30  ;;  %p1491_p5 = scmp.lt.s32.totalorder %s1485_s30, %s1485_s30 }
  0x10   :  { %p1492_p6 = por %p1491_p5, %p1490_p4 }
  0x12   :  { %p1493_p7 = pnand %p1492_p6, %p1486_p3 }
  0x14   :  { %1496 = shalt.err (!%p1493_p7)
}
  0x15   :  { %s1571_s16 = smov 128   ;;  %s1572_s17 = smov 8  }
  0x16   :  { %48 = dma.hbm_to_vmem [thread:$0]  %s1836_s1, 512, %s43_s21, [#allocation6], %s1571_s16, %s1571_s16, %s1572_s17  }
  0x17   :  { %s1497_s24 = scalar_lea.hbm %s1835_s0, 256 }
  0x18   :  { %p1498_p8 = scmp.ne.s32.totalorder %s1835_s0, %s1497_s24  ;;  %p1501_p9 = scmp.lt.u32.totalorder %s1497_s24, %s1835_s0 }
  0x1a   :  { %p1503_p10 = pnand %p1501_p9, %p1498_p8 }
  0x1c   :  { %1506 = shalt.err (!%p1503_p10)
}
  0x1d   :  { %s1507_s14 = scalar_lea.vmem %s1662_s23, 256  ;;  %p1512_p12 = scmp.lt.s32.totalorder %s1662_s23, %s1662_s23 }
  0x1e   :  { %p1508_p11 = scmp.ne.s32.totalorder %s1662_s23, %s1507_s14  ;;  %p1513_p13 = scmp.lt.s32.totalorder %s1507_s14, %s1507_s14 }
  0x20   :  { %p1514_p0 = por %p1513_p13, %p1512_p12 }
  0x22   :  { %p1515_p1 = pnand %p1514_p0, %p1508_p11 }
  0x24   :  { %1518 = shalt.err (!%p1515_p1)
}
  0x25   :  { %36 = dma.hbm_to_vmem [thread:$0]  %s1835_s0, 256, %s1662_s23, [#allocation4], %s1571_s16, %s1571_s16, %s1572_s17  }
  0x26   :  { %s1573_s29 = smov [#allocation7]   ;;  %s1574_s18 = smov [#allocation8]  }
  0x27   :  { %s60_s30 = sshll.u32 %s1573_s29, 4  ;;  %s78_s19 = sshll.u32 %s1574_s18, 4  ;;  %s61_s30 = int_to_ptr.vmem [resolvable:$true] %s60_s30  ;;  %s1699_s19 = int_to_ptr.vmem [resolvable:$true] %s78_s19 }
  0x28   :  { %s1519_s24 = scalar_lea.hbm %s1840_s5, 4096 }
  0x29   :  { %p1520_p2 = scmp.ne.s32.totalorder %s1840_s5, %s1519_s24  ;;  %p1523_p3 = scmp.lt.u32.totalorder %s1519_s24, %s1840_s5 }
  0x2b   :  { %p1525_p4 = pnand %p1523_p3, %p1520_p2 }
  0x2d   :  { %1528 = shalt.err (!%p1525_p4)
}
  0x2e   :  { %s1529_s0 = scalar_lea.vmem %s61_s30, 4096  ;;  %p1534_p6 = scmp.lt.s32.totalorder %s61_s30, %s61_s30 }
  0x2f   :  { %p1530_p5 = scmp.ne.s32.totalorder %s61_s30, %s1529_s0  ;;  %p1535_p7 = scmp.lt.s32.totalorder %s1529_s0, %s1529_s0 }
  0x31   :  { %p1536_p8 = por %p1535_p7, %p1534_p6 }
  0x33   :  { %p1537_p9 = pnand %p1536_p8, %p1530_p5 }
  0x35   :  { %1540 = shalt.err (!%p1537_p9)
}
  0x36   :  { %66 = dma.hbm_to_vmem [thread:$0]  %s1840_s5, 4096, %s61_s30, [#allocation6], %s1571_s16, %s1571_s16, %s1572_s17  }
  0x37   :  { %s1541_s29 = scalar_lea.hbm %s1844_s9, 8192 }
  0x38   :  { %p1542_p10 = scmp.ne.s32.totalorder %s1844_s9, %s1541_s29  ;;  %p1545_p11 = scmp.lt.u32.totalorder %s1541_s29, %s1844_s9 }
  0x3a   :  { %p1547_p12 = pnand %p1545_p11, %p1542_p10 }
  0x3c   :  { %1550 = shalt.err (!%p1547_p12)
}
  0x3d   :  { %s1551_s25 = scalar_lea.vmem %s1699_s19, 8192  ;;  %p1556_p0 = scmp.lt.s32.totalorder %s1699_s19, %s1699_s19 }
  0x3e   :  { %p1552_p13 = scmp.ne.s32.totalorder %s1699_s19, %s1551_s25  ;;  %p1557_p1 = scmp.lt.s32.totalorder %s1551_s25, %s1551_s25 }
  0x40   :  { %p1558_p2 = por %p1557_p1, %p1556_p0 }
  0x42   :  { %p1559_p3 = pnand %p1558_p2, %p1552_p13 }
  0x44   :  { %1562 = shalt.err (!%p1559_p3)
}
  0x45   :  { %s1575_s5 = smov 256   ;;  %s1576_s16 = smov 16  }
  0x46   :  { %84 = dma.hbm_to_vmem [thread:$0]  %s1844_s9, 8192, %s1699_s19, [#allocation9], %s1575_s5, %s1575_s5, %s1576_s16  }
  0x47   :  { %1563 = dma.done.wait [#allocation4], 256  }
  0x48   :  { %1564 = vsyncadd [#allocation4], 4294967040 }
  0x49   :  { %1565 = dma.done.wait [#allocation6], 4608  }
  0x4a   :  { %1566 = vsyncadd [#allocation6], 4294962688 }
  0x4b   :  { %1567 = dma.done.wait [#allocation9], 8192  }
  0x4c   :  { %1568 = vsyncadd [#allocation9], 4294959104  ;;  %v1577_v1 = vmov 0   ;;  %v1313_v2 = vld [vmem:[#allocation5 + $0x4] ss:$8 sps:$4 sm:$0xff]   ;;  %v119_v6 = vld [vmem:[#allocation3] sm:$0xff]  ;;  %v127_v9 = vlaneseq }
  0x4d   :  { %193 = vmatprep.mubr.bf16.mxu0 %v1577_v1  ;;  %v1315_v3 = vld [vmem:[#allocation5] ss:$8 sps:$4 sm:$0xff]   ;;  %161 = vmatprep.subr.bf16.mxu0 %v1313_v2  ;;  %v1316_v4 = vld [vmem:[#allocation5 + $0x14] ss:$8 sps:$4 sm:$0xff]   ;;  %v1318_v5 = vld [vmem:[#allocation5 + $0x10] ss:$8 sps:$4 sm:$0xff]  }
  0x4e   :  { %162 = vmatpush1.bf16.msra.mxu0 %v1315_v3  ;;  %v120_v7 = vld [vmem:[#allocation3 + $0x8] sm:$0xff]  ;;  %vm157_vm0 = vcmask 261120   ;;  %v1733_v10 = vshrl.u32 %v127_v9, 7  ;;  %v108_v12 = vld [vmem:[%s1837_s2] sm:$0x3]  ;;  %v205_v44 = vand.u32 127, %v127_v9 }
  0x4f   :  { %163 = vmatprep.subr.bf16.mxu0 %v1316_v4  ;;  %v121_v8 = vpack.c.bf16 %v120_v7, %v119_v6  ;;  %v1319_v26 = vld [vmem:[#allocation7 + $0x4] ss:$8 sps:$4 sm:$0xff]   ;;  %v1321_v27 = vld [vmem:[#allocation7] ss:$8 sps:$4 sm:$0xff]   ;;  %v1322_v28 = vld [vmem:[#allocation7 + $0x14] ss:$8 sps:$4 sm:$0xff]  }
  0x50   :  { %v1736_v11 = vsub.s32 0, %v1733_v10  ;;  %v1742_v13 = vsub.s32 1, %v1733_v10  ;;  %488 = vmatprep.subr.bf16.mxu1 %v1319_v26  ;;  %v1324_v29 = vld [vmem:[#allocation7 + $0x10] ss:$8 sps:$4 sm:$0xff]   ;;  %v1325_v30 = vld [vmem:[#allocation7 + $0x24] ss:$8 sps:$4 sm:$0xff]  }
  0x51   :  { %489 = vmatpush1.bf16.msra.mxu1 %v1321_v27  ;;  %v1327_v31 = vld [vmem:[#allocation7 + $0x20] ss:$8 sps:$4 sm:$0xff]   ;;  %v1328_v32 = vld [vmem:[#allocation7 + $0x34] ss:$8 sps:$4 sm:$0xff]   ;;  %v1330_v33 = vld [vmem:[#allocation7 + $0x30] ss:$8 sps:$4 sm:$0xff]  }
  0x52   :  { %164 = vmatpush1.bf16.msra.mxu0 %v1318_v5  ;;  %v130_v14 = vrot.slane %v108_v12, %v1736_v11  ;;  %v134_v15 = vrot.slane %v108_v12, %v1742_v13  ;;  %490 = vmatprep.subr.bf16.mxu1 %v1322_v28  ;;  %v1331_v34 = vld [vmem:[#allocation7 + $0x44] ss:$8 sps:$4 sm:$0xff]   ;;  %v1333_v35 = vld [vmem:[#allocation7 + $0x40] ss:$8 sps:$4 sm:$0xff]   ;;  %v1334_v36 = vld [vmem:[#allocation7 + $0x54] ss:$8 sps:$4 sm:$0xff]  }
  0x53   :  { %v1336_v37 = vld [vmem:[#allocation7 + $0x50] ss:$8 sps:$4 sm:$0xff]   ;;  %v1337_v38 = vld [vmem:[#allocation7 + $0x64] ss:$8 sps:$4 sm:$0xff]   ;;  %v1339_v39 = vld [vmem:[#allocation7 + $0x60] ss:$8 sps:$4 sm:$0xff]  }
  0x54   :  { %v1340_v40 = vld [vmem:[#allocation7 + $0x74] ss:$8 sps:$4 sm:$0xff]   ;;  %v1342_v41 = vld [vmem:[#allocation7 + $0x70] ss:$8 sps:$4 sm:$0xff]   ;;  %v1343_v42 = vld [vmem:[#allocation7 + $0x84] ss:$8 sps:$4 sm:$0xff]  }
  0x55   :  { %1204 = vmatmul.mubr.msk.bf16.vlgmr.msra.gmra.mrb[0].mxu0 %vm157_vm0, %v121_v8  ;;  %491 = vmatpush1.bf16.msra.mxu1 %v1324_v29  ;;  %v1345_v43 = vld [vmem:[#allocation7 + $0x80] ss:$8 sps:$4 sm:$0xff]   ;;  %v206_v45 = vadd.s32 128, %v205_v44  ;;  %v1578_v48 = vmov 0.0   ;;  %v1346_v0 = vld [vmem:[#allocation7 + $0x94] ss:$8 sps:$4 sm:$0xff]  }
  0x56   :  { %492 = vmatprep.subr.bf16.mxu1 %v1325_v30  ;;  %v1348_v1 = vld [vmem:[#allocation7 + $0x90] ss:$8 sps:$4 sm:$0xff]   ;;  %v1349_v2 = vld [vmem:[#allocation7 + $0xa4] ss:$8 sps:$4 sm:$0xff]   ;;  %v1351_v3 = vld [vmem:[#allocation7 + $0xa0] ss:$8 sps:$4 sm:$0xff]  }
  0x57   :  { %vm208_vm1 = vcmp.lt.s32.totalorder %v206_v45, 129  ;;  %v1352_v4 = vld [vmem:[#allocation7 + $0xb4] ss:$8 sps:$4 sm:$0xff]   ;;  %v1354_v5 = vld [vmem:[#allocation7 + $0xb0] ss:$8 sps:$4 sm:$0xff]   ;;  %vm1190_vm2 = vcmask 7168  }
  0x58   :  { %v1205_v49 = vsel %vm208_vm1, 1.0, %v1578_v48  ;;  %v1355_v6 = vld [vmem:[#allocation7 + $0xc4] ss:$8 sps:$4 sm:$0xff]   ;;  %v1357_v7 = vld [vmem:[#allocation7 + $0xc0] ss:$8 sps:$4 sm:$0xff]  }
  0x59   :  { %493 = vmatpush1.bf16.msra.mxu1 %v1327_v31  ;;  %v1358_v8 = vld [vmem:[#allocation7 + $0xd4] ss:$8 sps:$4 sm:$0xff]   ;;  %v1360_v9 = vld [vmem:[#allocation7 + $0xd0] ss:$8 sps:$4 sm:$0xff]   ;;  %v1361_v12 = vld [vmem:[#allocation7 + $0xe4] ss:$8 sps:$4 sm:$0xff]  }
  0x5a   :  { %494 = vmatprep.subr.bf16.mxu1 %v1328_v32  ;;  %v110_v27 = vld [vmem:[%s1839_s4] sm:$0x3] }
  0x5b   :  { %v268_v31 = vrot.slane %v110_v27, %v1736_v11  ;;  %v272_v32 = vrot.slane %v110_v27, %v1742_v13  ;;  %v1403_v27 = vld [vmem:[#allocation8 + $0xc0] ss:$16 sps:$4 sm:$0xff]  }
  0x5d   :  { %495 = vmatpush1.bf16.msra.mxu1 %v1330_v33 }
  0x5e   :  { %496 = vmatprep.subr.bf16.mxu1 %v1331_v34 }
  0x61   :  { %497 = vmatpush1.bf16.msra.mxu1 %v1333_v35 }
  0x62   :  { %498 = vmatprep.subr.bf16.mxu1 %v1334_v36 }
  0x65   :  { %499 = vmatpush1.bf16.msra.mxu1 %v1336_v37 }
  0x66   :  { %500 = vmatprep.subr.bf16.mxu1 %v1337_v38 }
  0x69   :  { %501 = vmatpush1.bf16.msra.mxu1 %v1339_v39 }
  0x6a   :  { %502 = vmatprep.subr.bf16.mxu1 %v1340_v40 }
  0x6d   :  { %503 = vmatpush1.bf16.msra.mxu1 %v1342_v41 }
  0x6e   :  { %504 = vmatprep.subr.bf16.mxu1 %v1343_v42 }
  0x71   :  { %505 = vmatpush1.bf16.msra.mxu1 %v1345_v43 }
  0x72   :  { %506 = vmatprep.subr.bf16.mxu1 %v1346_v0  ;;  %v1370_v0 = vld [vmem:[#allocation8 + $0x8] ss:$16 sps:$4 sm:$0xff]  }
  0x75   :  { %507 = vmatpush1.bf16.msra.mxu1 %v1348_v1  ;;  %v1372_v1 = vld [vmem:[#allocation8 + $0xc] ss:$16 sps:$4 sm:$0xff]  }
  0x76   :  { %508 = vmatprep.subr.bf16.mxu1 %v1349_v2  ;;  %v1375_v2 = vld [vmem:[#allocation8 + $0x24] ss:$16 sps:$4 sm:$0xff]  }
  0x79   :  { %509 = vmatpush1.bf16.msra.mxu1 %v1351_v3  ;;  %v1378_v3 = vld [vmem:[#allocation8 + $0x2c] ss:$16 sps:$4 sm:$0xff]  }
  0x7a   :  { %510 = vmatprep.subr.bf16.mxu1 %v1352_v4  ;;  %v1373_v4 = vld [vmem:[#allocation8 + $0x20] ss:$16 sps:$4 sm:$0xff]  }
  0x7d   :  { %511 = vmatpush1.bf16.msra.mxu1 %v1354_v5  ;;  %v1376_v5 = vld [vmem:[#allocation8 + $0x28] ss:$16 sps:$4 sm:$0xff]  }
  0x7e   :  { %512 = vmatprep.subr.bf16.mxu1 %v1355_v6  ;;  %v1381_v6 = vld [vmem:[#allocation8 + $0x44] ss:$16 sps:$4 sm:$0xff]  }
  0x81   :  { %513 = vmatpush1.bf16.msra.mxu1 %v1357_v7  ;;  %v1384_v7 = vld [vmem:[#allocation8 + $0x4c] ss:$16 sps:$4 sm:$0xff]  }
  0x82   :  { %514 = vmatprep.subr.bf16.mxu1 %v1358_v8  ;;  %v1379_v8 = vld [vmem:[#allocation8 + $0x40] ss:$16 sps:$4 sm:$0xff]  }
  0x85   :  { %515 = vmatpush1.bf16.msra.mxu1 %v1360_v9  ;;  %v1382_v9 = vld [vmem:[#allocation8 + $0x48] ss:$16 sps:$4 sm:$0xff]  }
  0x86   :  { %516 = vmatprep.subr.bf16.mxu1 %v1361_v12  ;;  %v1387_v12 = vld [vmem:[#allocation8 + $0x64] ss:$16 sps:$4 sm:$0xff]  }
 0x128   :  { %v195_v16 = vpop.f32.mrb[0].mxu0 }
 0x129   :  { %v196_v17 = vadd.f32 %v195_v16, %v130_v14  ;;  %v197_v18 = vpop.f32.mrb[1].mxu0  ;;  %v1366_v16 = vld [vmem:[#allocation7 + $0xf0] ss:$8 sps:$4 sm:$0xff]  }
 0x12a   :  { %v198_v19 = vadd.f32 %v197_v18, %v134_v15  ;;  %v199_v20 = vpop.f32.mrb[2].mxu0 }
 0x12b   :  { %v201_v21 = vpop.f32.mrb[3].mxu0  ;;  %v200_v22 = vadd.f32 %v199_v20, %v130_v14  ;;  %v1363_v14 = vld [vmem:[#allocation7 + $0xe0] ss:$8 sps:$4 sm:$0xff]  }
 0x12c   :  { %v202_v23 = vadd.f32 %v201_v21, %v134_v15  ;;  %v213_v24 = vadd.f32 %v198_v19, %v196_v17  ;;  %v1364_v15 = vld [vmem:[#allocation7 + $0xf4] ss:$8 sps:$4 sm:$0xff]   ;;  %517 = vmatpush1.bf16.msra.mxu1 %v1363_v14 }
 0x12d   :  { %518 = vmatprep.subr.bf16.mxu1 %v1364_v15  ;;  %v1390_v14 = vld [vmem:[#allocation8 + $0x6c] ss:$16 sps:$4 sm:$0xff]   ;;  %v1385_v15 = vld [vmem:[#allocation8 + $0x60] ss:$16 sps:$4 sm:$0xff]  }
 0x12e   :  { %214 = vadd.xlane.f32.xlu0 %v213_v24  ;;  %v216_v25 = vadd.f32 %v202_v23, %v200_v22 }
 0x130   :  { %519 = vmatpush1.bf16.msra.mxu1 %v1366_v16  ;;  %v1388_v16 = vld [vmem:[#allocation8 + $0x68] ss:$16 sps:$4 sm:$0xff]  }
 0x131   :  { %1048 = vmatprep.subr.bf16.mxu1 %v1372_v1  ;;  %v1439_v1 = vld [vmem:[#allocation8 + $0x180] ss:$16 sps:$4 sm:$0xff]  }
 0x132   :  { %217 = vadd.xlane.f32.xlu0 %v216_v25 }
 0x1bb   :  { %v215_v46 = vpop.xlane.xlu0 %214 }
 0x1bc   :  { %v219_v47 = vmul.f32 0.007751938, %v215_v46 }
 0x1be   :  { %v221_v50 = vsub.f32 %v196_v17, %v219_v47  ;;  %v222_v51 = vsub.f32 %v198_v19, %v219_v47 }
 0x1bf   :  { %v218_v52 = vpop.xlane.xlu0 %217 }
 0x1c0   :  { %v220_v53 = vmul.f32 0.007751938, %v218_v52  ;;  %v226_v54 = vmul.f32 %v1205_v49, %v222_v51  ;;  %v229_v57 = vmul.f32 %v221_v50, %v221_v50 }
 0x1c2   :  { %v223_v55 = vsub.f32 %v200_v22, %v220_v53  ;;  %v224_v56 = vsub.f32 %v202_v23, %v220_v53  ;;  %v230_v58 = vmul.f32 %v226_v54, %v226_v54  ;;  %v109_v23 = vld [vmem:[%s1838_s3] sm:$0x3] }
 0x1c3   :  { %v253_v24 = vrot.slane %v109_v23, %v1736_v11  ;;  %v257_v25 = vrot.slane %v109_v23, %v1742_v13  ;;  %v1397_v23 = vld [vmem:[#allocation8 + $0xa0] ss:$16 sps:$4 sm:$0xff]  }
 0x1c4   :  { %v228_v59 = vmul.f32 %v1205_v49, %v224_v56  ;;  %v233_v60 = vadd.f32 %v230_v58, %v229_v57  ;;  %v231_v61 = vmul.f32 %v223_v55, %v223_v55  ;;  %v111_v49 = vld [vmem:[%s1841_s6] sm:$0x3] }
 0x1c5   :  { %v325_v51 = vrot.slane %v111_v49, %v1742_v13 }
 0x1c6   :  { %234 = vadd.xlane.f32.xlu1 %v233_v60  ;;  %v232_v62 = vmul.f32 %v228_v59, %v228_v59 }
 0x1c8   :  { %v236_v63 = vadd.f32 %v232_v62, %v231_v61  ;;  %v1367_v62 = vld [vmem:[#allocation8] ss:$16 sps:$4 sm:$0xff]  }
 0x1ca   :  { %237 = vadd.xlane.f32.xlu1 %v236_v63  ;;  %v1369_v63 = vld [vmem:[#allocation8 + $0x4] ss:$16 sps:$4 sm:$0xff]  }
 0x1cb   :  { %1005 = vmatprep.subr.bf16.mxu0 %v1369_v63  ;;  %v1441_v63 = vld [vmem:[#allocation8 + $0x184] ss:$16 sps:$4 sm:$0xff]  }
 0x1cc   :  { %1006 = vmatpush1.bf16.msra.mxu0 %v1367_v62  ;;  %v1436_v62 = vld [vmem:[#allocation8 + $0x168] ss:$16 sps:$4 sm:$0xff]  }
 0x1cd   :  { %1007 = vmatprep.subr.bf16.mxu0 %v1375_v2  ;;  %v1442_v2 = vld [vmem:[#allocation8 + $0x188] ss:$16 sps:$4 sm:$0xff]  }
 0x1d0   :  { %1008 = vmatpush1.bf16.msra.mxu0 %v1373_v4  ;;  %v1450_v4 = vld [vmem:[#allocation8 + $0x1ac] ss:$16 sps:$4 sm:$0xff]  }
 0x1d1   :  { %1009 = vmatprep.subr.bf16.mxu0 %v1381_v6  ;;  %v1448_v6 = vld [vmem:[#allocation8 + $0x1a8] ss:$16 sps:$4 sm:$0xff]  }
 0x1d4   :  { %1010 = vmatpush1.bf16.msra.mxu0 %v1379_v8  ;;  %v1453_v8 = vld [vmem:[#allocation8 + $0x1c4] ss:$16 sps:$4 sm:$0xff]  }
 0x1d5   :  { %1011 = vmatprep.subr.bf16.mxu0 %v1387_v12  ;;  %v1456_v12 = vld [vmem:[#allocation8 + $0x1cc] ss:$16 sps:$4 sm:$0xff]  }
 0x1d8   :  { %1012 = vmatpush1.bf16.msra.mxu0 %v1385_v15  ;;  %v1462_v15 = vld [vmem:[#allocation8 + $0x1ec] ss:$16 sps:$4 sm:$0xff]  }
 0x253   :  { %v235_v17 = vpop.xlane.xlu1 %234 }
 0x254   :  { %v239_v18 = vmul.f32 0.007751938, %v235_v17  ;;  %v1393_v17 = vld [vmem:[#allocation8 + $0x84] ss:$16 sps:$4 sm:$0xff]  }
 0x255   :  { %1013 = vmatprep.subr.bf16.mxu0 %v1393_v17  ;;  %v1460_v17 = vld [vmem:[#allocation8 + $0x1e8] ss:$16 sps:$4 sm:$0xff]  }
 0x256   :  { %v241_v19 = vadd.f32 1e-05, %v239_v18  ;;  %v1396_v18 = vld [vmem:[#allocation8 + $0x8c] ss:$16 sps:$4 sm:$0xff]  }
 0x257   :  { %v238_v20 = vpop.xlane.xlu1 %237 }
 0x258   :  { %1463 = vrsqrt.f32 %v241_v19  ;;  %v240_v21 = vmul.f32 0.007751938, %v238_v20  ;;  %v1391_v19 = vld [vmem:[#allocation8 + $0x80] ss:$16 sps:$4 sm:$0xff]   ;;  %v1394_v20 = vld [vmem:[#allocation8 + $0x88] ss:$16 sps:$4 sm:$0xff]  }
 0x259   :  { %1014 = vmatpush1.bf16.msra.mxu0 %v1391_v19 }
 0x25a   :  { %v242_v22 = vadd.f32 1e-05, %v240_v21  ;;  %v1399_v21 = vld [vmem:[#allocation8 + $0xa4] ss:$16 sps:$4 sm:$0xff]  }
 0x25b   :  { %1015 = vmatprep.subr.bf16.mxu0 %v1399_v21 }
 0x25c   :  { %1465 = vrsqrt.f32 %v242_v22  ;;  %v1402_v22 = vld [vmem:[#allocation8 + $0xac] ss:$16 sps:$4 sm:$0xff]  }
 0x25d   :  { %1016 = vmatpush1.bf16.msra.mxu0 %v1397_v23 }
 0x262   :  { %v1464_v26 = vpop.eup %1463 }
 0x263   :  { %v246_v28 = vmul.f32 %v1464_v26, %v226_v54  ;;  %v245_v29 = vmul.f32 %v1464_v26, %v221_v50  ;;  %v321_v50 = vrot.slane %v111_v49, %v1736_v11  ;;  %v1408_v26 = vld [vmem:[#allocation8 + $0xcc] ss:$16 sps:$4 sm:$0xff]  }
 0x265   :  { %v261_v30 = vmul.f32 %v257_v25, %v246_v28  ;;  %v260_v33 = vmul.f32 %v253_v24, %v245_v29  ;;  %v1406_v28 = vld [vmem:[#allocation8 + $0xc8] ss:$16 sps:$4 sm:$0xff]   ;;  %v1411_v29 = vld [vmem:[#allocation8 + $0xe4] ss:$16 sps:$4 sm:$0xff]  }
 0x266   :  { %v1466_v34 = vpop.eup %1465 }
 0x267   :  { %v248_v35 = vmul.f32 %v1466_v34, %v228_v59  ;;  %v247_v36 = vmul.f32 %v1466_v34, %v223_v55  ;;  %v276_v38 = vadd.f32 %v272_v32, %v261_v30  ;;  %v275_v40 = vadd.f32 %v268_v31, %v260_v33  ;;  %v1414_v30 = vld [vmem:[#allocation8 + $0xec] ss:$16 sps:$4 sm:$0xff]   ;;  %v1417_v33 = vld [vmem:[#allocation8 + $0x104] ss:$16 sps:$4 sm:$0xff]  }
 0x268   :  { %v1420_v34 = vld [vmem:[#allocation8 + $0x10c] ss:$16 sps:$4 sm:$0xff]  }
 0x269   :  { %v263_v37 = vmul.f32 %v257_v25, %v248_v35  ;;  %v262_v39 = vmul.f32 %v253_v24, %v247_v36  ;;  %v280_v43 = vmax.f32 %v276_v38, 0.0  ;;  %v279_v45 = vmax.f32 %v275_v40, 0.0  ;;  %v1400_v24 = vld [vmem:[#allocation8 + $0xa8] ss:$16 sps:$4 sm:$0xff]   ;;  %v1405_v25 = vld [vmem:[#allocation8 + $0xc4] ss:$16 sps:$4 sm:$0xff]  }
 0x26a   :  { %1017 = vmatprep.subr.bf16.mxu0 %v1405_v25  ;;  %v1415_v35 = vld [vmem:[#allocation8 + $0x100] ss:$16 sps:$4 sm:$0xff]   ;;  %v1418_v36 = vld [vmem:[#allocation8 + $0x108] ss:$16 sps:$4 sm:$0xff]  }
 0x26b   :  { %v278_v41 = vadd.f32 %v272_v32, %v263_v37  ;;  %v277_v42 = vadd.f32 %v268_v31, %v262_v39  ;;  %1018 = vmatpush1.bf16.msra.mxu0 %v1403_v27  ;;  %v1409_v31 = vld [vmem:[#allocation8 + $0xe0] ss:$16 sps:$4 sm:$0xff]   ;;  %v1412_v32 = vld [vmem:[#allocation8 + $0xe8] ss:$16 sps:$4 sm:$0xff]  }
 0x26c   :  { %1019 = vmatprep.subr.bf16.mxu0 %v1411_v29  ;;  %v113_v25 = vld [vmem:[%s1843_s8] sm:$0x3] }
 0x26d   :  { %v282_v44 = vmax.f32 %v278_v41, 0.0  ;;  %v281_v46 = vmax.f32 %v277_v42, 0.0 }
 0x26f   :  { %v284_v47 = vpack.c.bf16 %v282_v44, %v280_v43  ;;  %v283_v48 = vpack.c.bf16 %v281_v46, %v279_v45  ;;  %1020 = vmatpush1.bf16.msra.mxu0 %v1409_v31  ;;  %v583_v31 = vrot.slane %v113_v25, %v1736_v11 }
 0x270   :  { %1021 = vmatprep.subr.bf16.mxu0 %v1417_v33 }
 0x271   :  { %520 = vmatprep.mubr.bf16.mxu1 %v284_v47 }
 0x272   :  { %521 = vmatmul.mubr.bf16.vlgmr.msra.gmra.mrb[0].mxu1 %v283_v48 }
 0x273   :  { %1049 = vmatpush1.bf16.msra.mxu1 %v1370_v0  ;;  %1022 = vmatpush1.bf16.msra.mxu0 %v1415_v35  ;;  %v1444_v0 = vld [vmem:[#allocation8 + $0x18c] ss:$16 sps:$4 sm:$0xff]  }
 0x274   :  { %1050 = vmatprep.subr.bf16.mxu1 %v1378_v3  ;;  %v1447_v3 = vld [vmem:[#allocation8 + $0x1a4] ss:$16 sps:$4 sm:$0xff]  }
 0x277   :  { %1051 = vmatpush1.bf16.msra.mxu1 %v1376_v5  ;;  %v1445_v5 = vld [vmem:[#allocation8 + $0x1a0] ss:$16 sps:$4 sm:$0xff]  }
 0x278   :  { %1052 = vmatprep.subr.bf16.mxu1 %v1384_v7  ;;  %v1451_v7 = vld [vmem:[#allocation8 + $0x1c0] ss:$16 sps:$4 sm:$0xff]  }
 0x27b   :  { %1053 = vmatpush1.bf16.msra.mxu1 %v1382_v9  ;;  %v1454_v9 = vld [vmem:[#allocation8 + $0x1c8] ss:$16 sps:$4 sm:$0xff]  }
 0x27c   :  { %1054 = vmatprep.subr.bf16.mxu1 %v1390_v14  ;;  %v1459_v14 = vld [vmem:[#allocation8 + $0x1e4] ss:$16 sps:$4 sm:$0xff]  }
 0x27f   :  { %1055 = vmatpush1.bf16.msra.mxu1 %v1388_v16  ;;  %v1457_v16 = vld [vmem:[#allocation8 + $0x1e0] ss:$16 sps:$4 sm:$0xff]  }
 0x280   :  { %1056 = vmatprep.subr.bf16.mxu1 %v1396_v18 }
 0x283   :  { %1057 = vmatpush1.bf16.msra.mxu1 %v1394_v20 }
 0x284   :  { %1058 = vmatprep.subr.bf16.mxu1 %v1402_v22 }
 0x287   :  { %1059 = vmatpush1.bf16.msra.mxu1 %v1400_v24  ;;  %v112_v24 = vld [vmem:[%s1842_s7] sm:$0x3] }
 0x288   :  { %1060 = vmatprep.subr.bf16.mxu1 %v1408_v26  ;;  %v568_v26 = vrot.slane %v112_v24, %v1736_v11  ;;  %v572_v27 = vrot.slane %v112_v24, %v1742_v13 }
 0x28b   :  { %1061 = vmatpush1.bf16.msra.mxu1 %v1406_v28 }
 0x28c   :  { %1062 = vmatprep.subr.bf16.mxu1 %v1414_v30 }
 0x28f   :  { %1063 = vmatpush1.bf16.msra.mxu1 %v1412_v32  ;;  %v587_v32 = vrot.slane %v113_v25, %v1742_v13 }
 0x290   :  { %1064 = vmatprep.subr.bf16.mxu1 %v1420_v34 }
 0x293   :  { %1065 = vmatpush1.bf16.msra.mxu1 %v1418_v36 }
 0x345   :  { %v522_v52 = vpop.f32.mrb[0].mxu1 }
 0x346   :  { %v1761_v53 = vadd.f32 %v522_v52, %v321_v50  ;;  %v524_v54 = vpop.f32.mrb[1].mxu1  ;;  %v1426_v52 = vld [vmem:[#allocation8 + $0x12c] ss:$16 sps:$4 sm:$0xff]  }
 0x347   :  { %v1763_v55 = vadd.f32 %v524_v54, %v325_v51  ;;  %v526_v56 = vpop.f32.mrb[2].mxu1  ;;  %v1424_v54 = vld [vmem:[#allocation8 + $0x128] ss:$16 sps:$4 sm:$0xff]   ;;  %1066 = vmatprep.subr.bf16.mxu1 %v1426_v52  ;;  %v679_v52 = vsub.s32 3, %v1733_v10 }
 0x348   :  { %v1765_v57 = vadd.f32 %v526_v56, %v321_v50  ;;  %v528_v58 = vpop.f32.mrb[3].mxu1  ;;  %1067 = vmatpush1.bf16.msra.mxu1 %v1424_v54  ;;  %v1432_v56 = vld [vmem:[#allocation8 + $0x14c] ss:$16 sps:$4 sm:$0xff]  }
 0x349   :  { %v1767_v59 = vadd.f32 %v528_v58, %v325_v51  ;;  %v531_v60 = vadd.f32 %v1763_v55, %v1761_v53  ;;  %v1423_v51 = vld [vmem:[#allocation8 + $0x124] ss:$16 sps:$4 sm:$0xff]   ;;  %v1430_v58 = vld [vmem:[#allocation8 + $0x148] ss:$16 sps:$4 sm:$0xff]   ;;  %1068 = vmatprep.subr.bf16.mxu1 %v1432_v56 }
 0x34a   :  { %1023 = vmatprep.subr.bf16.mxu0 %v1423_v51 }
 0x34b   :  { %532 = vadd.xlane.f32.xlu0 %v531_v60  ;;  %v534_v61 = vadd.f32 %v1767_v59, %v1765_v57  ;;  %v1438_v60 = vld [vmem:[#allocation8 + $0x16c] ss:$16 sps:$4 sm:$0xff]  }
 0x34c   :  { %1069 = vmatpush1.bf16.msra.mxu1 %v1430_v58 }
 0x34d   :  { %535 = vadd.xlane.f32.xlu1 %v534_v61  ;;  %v1433_v61 = vld [vmem:[#allocation8 + $0x160] ss:$16 sps:$4 sm:$0xff]   ;;  %1070 = vmatprep.subr.bf16.mxu1 %v1438_v60 }
 0x350   :  { %1071 = vmatpush1.bf16.msra.mxu1 %v1436_v62 }
 0x351   :  { %1072 = vmatprep.subr.bf16.mxu1 %v1444_v0 }
 0x354   :  { %1073 = vmatpush1.bf16.msra.mxu1 %v1442_v2 }
 0x355   :  { %1074 = vmatprep.subr.bf16.mxu1 %v1450_v4 }
 0x358   :  { %1075 = vmatpush1.bf16.msra.mxu1 %v1448_v6 }
 0x359   :  { %1076 = vmatprep.subr.bf16.mxu1 %v1456_v12 }
 0x35c   :  { %1077 = vmatpush1.bf16.msra.mxu1 %v1454_v9 }
 0x35d   :  { %1078 = vmatprep.subr.bf16.mxu1 %v1462_v15 }
 0x360   :  { %1079 = vmatpush1.bf16.msra.mxu1 %v1460_v17 }
 0x3d8   :  { %v533_v37 = vpop.xlane.xlu0 %532 }
 0x3d9   :  { %v538_v38 = vmul.f32 0.00390625, %v533_v37 }
 0x3da   :  { %v536_v39 = vpop.xlane.xlu1 %535 }
 0x3db   :  { %v1774_v40 = vsub.f32 %v1761_v53, %v538_v38  ;;  %v1777_v41 = vsub.f32 %v1763_v55, %v538_v38  ;;  %v539_v42 = vmul.f32 0.00390625, %v536_v39  ;;  %v1421_v53 = vld [vmem:[#allocation8 + $0x120] ss:$16 sps:$4 sm:$0xff]   ;;  %v1429_v55 = vld [vmem:[#allocation8 + $0x144] ss:$16 sps:$4 sm:$0xff]  }
 0x3dc   :  { %1024 = vmatpush1.bf16.msra.mxu0 %v1421_v53 }
 0x3dd   :  { %v1780_v43 = vsub.f32 %v1765_v57, %v539_v42  ;;  %v1783_v44 = vsub.f32 %v1767_v59, %v539_v42  ;;  %v544_v45 = vmul.f32 %v1774_v40, %v1774_v40  ;;  %v545_v46 = vmul.f32 %v1777_v41, %v1777_v41  ;;  %v1427_v57 = vld [vmem:[#allocation8 + $0x140] ss:$16 sps:$4 sm:$0xff]   ;;  %1025 = vmatprep.subr.bf16.mxu0 %v1429_v55  ;;  %v1435_v59 = vld [vmem:[#allocation8 + $0x164] ss:$16 sps:$4 sm:$0xff]  }
 0x3df   :  { %v548_v47 = vadd.f32 %v545_v46, %v544_v45  ;;  %v546_v48 = vmul.f32 %v1780_v43, %v1780_v43  ;;  %v547_v49 = vmul.f32 %v1783_v44, %v1783_v44 }
 0x3e0   :  { %1026 = vmatpush1.bf16.msra.mxu0 %v1427_v57 }
 0x3e1   :  { %549 = vadd.xlane.f32.xlu0 %v548_v47  ;;  %v551_v50 = vadd.f32 %v547_v49, %v546_v48  ;;  %1027 = vmatprep.subr.bf16.mxu0 %v1435_v59 }
 0x3e3   :  { %552 = vadd.xlane.f32.xlu1 %v551_v50 }
 0x3e4   :  { %1028 = vmatpush1.bf16.msra.mxu0 %v1433_v61 }
 0x3e5   :  { %1029 = vmatprep.subr.bf16.mxu0 %v1441_v63 }
 0x3e8   :  { %1030 = vmatpush1.bf16.msra.mxu0 %v1439_v1 }
 0x3e9   :  { %1031 = vmatprep.subr.bf16.mxu0 %v1447_v3 }
 0x3ec   :  { %1032 = vmatpush1.bf16.msra.mxu0 %v1445_v5 }
 0x3ed   :  { %1033 = vmatprep.subr.bf16.mxu0 %v1453_v8 }
 0x3f0   :  { %1034 = vmatpush1.bf16.msra.mxu0 %v1451_v7 }
 0x3f1   :  { %1035 = vmatprep.subr.bf16.mxu0 %v1459_v14 }
 0x3f4   :  { %1036 = vmatpush1.bf16.msra.mxu0 %v1457_v16 }
 0x46e   :  { %v550_v18 = vpop.xlane.xlu0 %549 }
 0x46f   :  { %v554_v19 = vmul.f32 0.00390625, %v550_v18 }
 0x470   :  { %v553_v20 = vpop.xlane.xlu1 %552 }
 0x471   :  { %v556_v21 = vadd.f32 1e-05, %v554_v19  ;;  %v555_v22 = vmul.f32 0.00390625, %v553_v20 }
 0x473   :  { %1467 = vrsqrt.f32 %v556_v21  ;;  %v557_v23 = vadd.f32 1e-05, %v555_v22 }
 0x475   :  { %1469 = vrsqrt.f32 %v557_v23 }
 0x47d   :  { %v1468_v28 = vpop.eup %1467 }
 0x47e   :  { %v560_v29 = vmul.f32 %v1468_v28, %v1774_v40  ;;  %v561_v30 = vmul.f32 %v1468_v28, %v1777_v41 }
 0x47f   :  { %v1470_v33 = vpop.eup %1469 }
 0x480   :  { %v562_v34 = vmul.f32 %v1470_v33, %v1780_v43  ;;  %v563_v35 = vmul.f32 %v1470_v33, %v1783_v44  ;;  %v576_v36 = vmul.f32 %v572_v27, %v561_v30  ;;  %v575_v37 = vmul.f32 %v568_v26, %v560_v29  ;;  %v114_v44 = vld [vmem:[%s1845_s10] sm:$0xf] }
 0x481   :  { %v675_v43 = vsub.s32 2, %v1733_v10  ;;  %v668_v53 = vrot.slane %v114_v44, %v1736_v11  ;;  %v672_v55 = vrot.slane %v114_v44, %v1742_v13  ;;  %v680_v56 = vrot.slane %v114_v44, %v679_v52 }
 0x482   :  { %v578_v38 = vmul.f32 %v572_v27, %v563_v35  ;;  %v591_v39 = vadd.f32 %v587_v32, %v576_v36  ;;  %v577_v42 = vmul.f32 %v568_v26, %v562_v34  ;;  %v590_v45 = vadd.f32 %v583_v31, %v575_v37  ;;  %v115_v37 = vld [vmem:[%s1846_s11] sm:$0x3] }
 0x483   :  { %v676_v54 = vrot.slane %v114_v44, %v675_v43 }
 0x484   :  { %v593_v46 = vadd.f32 %v587_v32, %v578_v38  ;;  %v592_v47 = vadd.f32 %v583_v31, %v577_v42  ;;  %v595_v40 = vmax.f32 %v591_v39, 0.0  ;;  %v594_v41 = vmax.f32 %v590_v45, 0.0  ;;  %v116_v38 = vld [vmem:[%s1847_s12] sm:$0x3] }
 0x485   :  { %v1131_v39 = vrot.slane %v115_v37, %v1736_v11  ;;  %v1135_v42 = vrot.slane %v115_v37, %v1742_v13 }
 0x486   :  { %v597_v48 = vmax.f32 %v593_v46, 0.0  ;;  %v596_v49 = vmax.f32 %v592_v47, 0.0  ;;  %v117_v46 = vld [vmem:[%s1848_s13] sm:$0x3] }
 0x487   :  { %v1165_v52 = vrot.slane %v117_v46, %v1736_v11 }
 0x488   :  { %v599_v50 = vpack.c.bf16 %v597_v48, %v595_v40  ;;  %v598_v51 = vpack.c.bf16 %v596_v49, %v594_v41  ;;  %v1146_v48 = vrot.slane %v116_v38, %v1736_v11  ;;  %v1150_v41 = vrot.slane %v116_v38, %v1742_v13  ;;  %v1302_v11 = vld [vmem:[#allocation2] ss:$0 sm:$0xff] }
 0x48a   :  { %1037 = vmatprep.mubr.bf16.mxu0 %v599_v50  ;;  %1080 = vmatprep.mubr.bf16.mxu1 %v599_v50 }
 0x48b   :  { %1038 = vmatmul.mubr.bf16.vlgmr.msra.gmra.mrb[4].mxu0 %v598_v51  ;;  %1081 = vmatmul.mubr.bf16.vlgmr.msra.gmra.mrb[4].mxu1 %v598_v51 }
 0x55e   :  { %v1039_v57 = vpop.f32.mrb[4].mxu0  ;;  %v1082_v58 = vpop.f32.mrb[4].mxu1 }
 0x55f   :  { %v1040_v59 = vadd.f32 %v1039_v57, %v668_v53  ;;  %v1083_v60 = vadd.f32 %v1082_v58, %v676_v54  ;;  %v1041_v61 = vpop.f32.mrb[5].mxu0  ;;  %v1084_v62 = vpop.f32.mrb[5].mxu1 }
 0x560   :  { %v1042_v63 = vadd.f32 %v1041_v61, %v672_v55  ;;  %v1085_v0 = vadd.f32 %v1084_v62, %v680_v56  ;;  %v1043_v1 = vpop.f32.mrb[6].mxu0  ;;  %v1086_v2 = vpop.f32.mrb[6].mxu1 }
 0x561   :  { %v1091_v3 = vmax.f32 %v1040_v59, %v1083_v60  ;;  %v1044_v4 = vadd.f32 %v1043_v1, %v668_v53  ;;  %v1087_v5 = vadd.f32 %v1086_v2, %v676_v54  ;;  %v1045_v10 = vpop.f32.mrb[7].mxu0  ;;  %v1088_v6 = vpop.f32.mrb[7].mxu1  ;;  %v1169_v53 = vrot.slane %v117_v46, %v1742_v13 }
 0x562   :  { %v1092_v7 = vmax.f32 %v1042_v63, %v1085_v0  ;;  %v1046_v8 = vadd.f32 %v1045_v10, %v672_v55  ;;  %v1089_v9 = vadd.f32 %v1088_v6, %v680_v56 }
 0x563   :  { %v1093_v12 = vmax.f32 %v1044_v4, %v1087_v5 }
 0x564   :  { %v1094_v14 = vmax.f32 %v1046_v8, %v1089_v9  ;;  %v1095_v15 = vadd.f32 %v1092_v7, %v1091_v3 }
 0x566   :  { %1096 = vadd.xlane.f32.xlu0 %v1095_v15  ;;  %v1098_v16 = vadd.f32 %v1094_v14, %v1093_v12 }
 0x568   :  { %1099 = vadd.xlane.f32.xlu1 %v1098_v16 }
 0x5f3   :  { %v1097_v17 = vpop.xlane.xlu0 %1096 }
 0x5f4   :  { %v1101_v18 = vmul.f32 0.00390625, %v1097_v17 }
 0x5f5   :  { %v1100_v19 = vpop.xlane.xlu1 %1099 }
 0x5f6   :  { %v1103_v20 = vsub.f32 %v1091_v3, %v1101_v18  ;;  %v1104_v21 = vsub.f32 %v1092_v7, %v1101_v18  ;;  %v1102_v22 = vmul.f32 0.00390625, %v1100_v19 }
 0x5f8   :  { %v1105_v23 = vsub.f32 %v1093_v12, %v1102_v22  ;;  %v1106_v24 = vsub.f32 %v1094_v14, %v1102_v22  ;;  %v1107_v25 = vmul.f32 %v1103_v20, %v1103_v20  ;;  %v1108_v26 = vmul.f32 %v1104_v21, %v1104_v21 }
 0x5fa   :  { %v1111_v27 = vadd.f32 %v1108_v26, %v1107_v25  ;;  %v1109_v28 = vmul.f32 %v1105_v23, %v1105_v23  ;;  %v1110_v29 = vmul.f32 %v1106_v24, %v1106_v24 }
 0x5fc   :  { %1112 = vadd.xlane.f32.xlu0 %v1111_v27  ;;  %v1114_v30 = vadd.f32 %v1110_v29, %v1109_v28 }
 0x5fe   :  { %1115 = vadd.xlane.f32.xlu1 %v1114_v30 }
 0x689   :  { %v1113_v31 = vpop.xlane.xlu0 %1112 }
 0x68a   :  { %v1117_v32 = vmul.f32 0.00390625, %v1113_v31 }
 0x68b   :  { %v1116_v33 = vpop.xlane.xlu1 %1115 }
 0x68c   :  { %v1119_v34 = vadd.f32 1e-05, %v1117_v32  ;;  %v1118_v35 = vmul.f32 0.00390625, %v1116_v33 }
 0x68e   :  { %1471 = vrsqrt.f32 %v1119_v34  ;;  %v1120_v36 = vadd.f32 1e-05, %v1118_v35 }
 0x690   :  { %1473 = vrsqrt.f32 %v1120_v36 }
 0x698   :  { %v1472_v45 = vpop.eup %1471 }
 0x699   :  { %v1123_v47 = vmul.f32 %v1472_v45, %v1103_v20  ;;  %v1124_v40 = vmul.f32 %v1472_v45, %v1104_v21 }
 0x69a   :  { %v1474_v49 = vpop.eup %1473 }
 0x69b   :  { %v1138_v50 = vmul.f32 %v1131_v39, %v1123_v47  ;;  %v1139_v51 = vmul.f32 %v1135_v42, %v1124_v40  ;;  %v1125_v43 = vmul.f32 %v1474_v49, %v1105_v23  ;;  %v1126_v44 = vmul.f32 %v1474_v49, %v1106_v24 }
 0x69d   :  { %v1153_v54 = vadd.f32 %v1146_v48, %v1138_v50  ;;  %v1154_v55 = vadd.f32 %v1150_v41, %v1139_v51  ;;  %v1140_v56 = vmul.f32 %v1131_v39, %v1125_v43  ;;  %v1141_v57 = vmul.f32 %v1135_v42, %v1126_v44 }
 0x69f   :  { %v1157_v58 = vmax.f32 %v1153_v54, 0.0  ;;  %v1158_v59 = vmax.f32 %v1154_v55, 0.0  ;;  %v1155_v60 = vadd.f32 %v1146_v48, %v1140_v56  ;;  %v1156_v61 = vadd.f32 %v1150_v41, %v1141_v57 }
 0x6a1   :  { %v1172_v62 = vmul.f32 %v1165_v52, %v1157_v58  ;;  %v1173_v63 = vmul.f32 %v1169_v53, %v1158_v59  ;;  %v1159_v0 = vmax.f32 %v1155_v60, 0.0  ;;  %v1160_v1 = vmax.f32 %v1156_v61, 0.0 }
 0x6a3   :  { %v1176_v2 = vadd.f32 %v1173_v63, %v1172_v62  ;;  %v1174_v3 = vmul.f32 %v1165_v52, %v1159_v0  ;;  %v1175_v4 = vmul.f32 %v1169_v53, %v1160_v1 }
 0x6a5   :  { %1177 = vadd.xlane.f32.xlu0 %v1176_v2  ;;  %v1179_v5 = vadd.f32 %v1175_v4, %v1174_v3 }
 0x6a7   :  { %1180 = vadd.xlane.f32.xlu1 %v1179_v5 }
 0x732   :  { %v1178_v13 = vpop.xlane.xlu0 %1177 }
 0x733   :  { %v1188_v10 = vadd.f32 %v1302_v11, %v1178_v13 }
 0x734   :  { %v1181_v6 = vpop.xlane.xlu1 %1180 }
 0x735   :  { %1191 = vst.msk [vmem:[%s1850_s15] sm:$0xff] %vm1190_vm2, %v1188_v10  ;;  %v1189_v7 = vadd.f32 %v1302_v11, %v1181_v6 }
 0x737   :  { %1192 = vst.msk [vmem:[%s1850_s15 + $0x8] sm:$0xff] %vm1190_vm2, %v1189_v7 }
 0x738   :  { %1197 = vsyncpa [#allocation4], 1 }
 0x739   :  { %1198 = vsyncpa [#allocation6], 1 }
 0x73a   :  { %1199 = vsyncpa [#allocation9], 1 }

</bundles_post_ra>
